<compile_context>
chip_gen: v5e
topology: v5e:2x2
jax: 0.10.0
libtpu: 0.0.40
codegen_flags: <defaults>
</compile_context>

<pallas_src>
import jax
import jax.numpy as jnp
from jax.experimental import pallas as pl
from jax.experimental.pallas import tpu as pltpu


def _cdiv(a, b):
    return -(-a // b)


def _round_up(x, m):
    return _cdiv(x, m) * m


# ---------------------------------------------------------------------------
# Kernel
# ---------------------------------------------------------------------------
def _predictor_kernel(h_ref, w1_ref, b1_ref, w2_ref, b2_ref, out_ref):
    # Layer 1: (tb, H) @ (H, HIDP) -> ReLU.  f32 accumulation on the MXU.
    hid = jnp.dot(h_ref[...], w1_ref[...], preferred_element_type=jnp.float32)
    hid = jnp.maximum(hid + b1_ref[...], 0.0)

    # Layer 2: (tb, HIDP) @ (HIDP, OUTP), f32 accumulation.
    hid = hid.astype(w2_ref.dtype)
    z = jnp.dot(hid, w2_ref[...], preferred_element_type=jnp.float32)
    z = z + b2_ref[...]

    # Shared-exp head epilogue (one exp + one log1p + one approx reciprocal
    # per element instead of sigmoid + logaddexp branches):
    #   e        = exp(-|z|)
    #   sigmoid  = z>=0 ? 1/(1+e) : e/(1+e)
    #   softplus = max(z, 0) + log1p(e)
    e = jnp.exp(-jnp.abs(z))
    inv = pl.reciprocal(1.0 + e, approx=True)          # EUP slot, ~free
    sig = jnp.where(z >= 0.0, inv, e * inv)
    sp = jnp.maximum(z, 0.0) + jnp.log1p(e)

    # Column mask keeps the single output lane-dense:
    #   col 0 -> sigmoid, 1..3 -> identity, 4..6 -> softplus, >=7 -> 0 (pad)
    col = jax.lax.broadcasted_iota(jnp.int32, z.shape, dimension=1)
    out = jnp.where(col < 1, sig,
          jnp.where(col < 4, z,
          jnp.where(col < 7, sp, 0.0)))
    out_ref[...] = out                                  # full-width unmasked vst


# ---------------------------------------------------------------------------
# Parameter preparation (do ONCE, outside the per-step forward)
# ---------------------------------------------------------------------------
def pad_predictor_params(w1, b1, w2, b2, *, use_bf16=True):
    """Pad/cast weights to MXU-friendly shapes. Call once (or cache)."""
    H, hidden = w1.shape
    out_dim = w2.shape[1]
    assert out_dim == 7, "head split (0:1, 1:4, 4:7) hard-codes out_dim=7"
    in_dtype = jnp.bfloat16 if use_bf16 else jnp.float32

    hid_p = _round_up(hidden, 128)   # 200 -> 256: full MXU tiles everywhere
    out_p = 128                      # 7 -> 128: lane-dense output slab

    w1_p = jnp.zeros((H, hid_p), in_dtype).at[:, :hidden].set(w1.astype(in_dtype))
    b1_p = jnp.zeros((1, hid_p), jnp.float32).at[:, :hidden].set(
        b1.reshape(1, hidden).astype(jnp.float32))
    w2_p = jnp.zeros((hid_p, out_p), in_dtype).at[:hidden, :out_dim].set(
        w2.astype(in_dtype))
    b2_p = jnp.zeros((1, out_p), jnp.float32).at[:, :out_dim].set(
        b2.reshape(1, out_dim).astype(jnp.float32))
    return dict(w1=w1_p, b1=b1_p, w2=w2_p, b2=b2_p,
                H=H, hid_p=hid_p, out_p=out_p, in_dtype=in_dtype)


# ---------------------------------------------------------------------------
# Batch-tile selection
# ---------------------------------------------------------------------------
def _choose_tiles(B, max_tile=2048):
    """Pick (tb, num_tiles) so tiles tightly cover round_up(B,8) rows,
    with >=2 (and even) grid steps whenever the batch allows (v7x megacore),
    and tb capped at `max_tile` (VMEM stays far below all scoped limits)."""
    b8 = _round_up(B, 8)
    if b8 <= 8:
        return b8, 1
    num_tiles = max(2, _cdiv(b8, max_tile))
    if num_tiles % 2:
        num_tiles += 1
    tb = _round_up(_cdiv(b8, num_tiles), 8)
    num_tiles = _cdiv(b8, tb)
    return tb, num_tiles


# ---------------------------------------------------------------------------
# Forward
# ---------------------------------------------------------------------------
def predictor_forward(h, padded_params, *, max_tile=2048):
    """h: (B, H) float32. Returns (z_pres_p, z_where_loc, z_where_scale).

    Call with as large a B as possible (all objects/timesteps batched) — the
    op is per-step-overhead bound at small B.
    """
    p = padded_params
    B, H = h.shape
    assert H == p["H"]
    hid_p, out_p, in_dtype = p["hid_p"], p["out_p"], p["in_dtype"]

    tb, num_tiles = _choose_tiles(B, max_tile=max_tile)
    b_pad = tb * num_tiles

    # Only the activations are padded/cast per call.
    h_p = jnp.zeros((b_pad, H), in_dtype).at[:B].set(h.astype(in_dtype))

    itemsize = 2 if in_dtype == jnp.bfloat16 else 4
    flops = 2 * b_pad * H * hid_p + 2 * b_pad * hid_p * out_p
    # exp + log1p + approx reciprocal per output element.
    transcendentals = 3 * b_pad * out_p
    bytes_accessed = (
        (h_p.size + p["w1"].size + p["w2"].size) * itemsize
        + (p["b1"].size + p["b2"].size + b_pad * out_p) * 4)

    out = pl.pallas_call(
        _predictor_kernel,
        out_shape=jax.ShapeDtypeStruct((b_pad, out_p), jnp.float32),
        grid=(num_tiles,),
        in_specs=[
            pl.BlockSpec((tb, H), lambda i: (i, 0)),
            pl.BlockSpec((H, hid_p), lambda i: (0, 0)),
            pl.BlockSpec((1, hid_p), lambda i: (0, 0)),
            pl.BlockSpec((hid_p, out_p), lambda i: (0, 0)),
            pl.BlockSpec((1, out_p), lambda i: (0, 0)),
        ],
        out_specs=pl.BlockSpec((tb, out_p), lambda i: (i, 0)),
        compiler_params=pltpu.CompilerParams(
            dimension_semantics=("parallel",)),
        cost_estimate=pl.CostEstimate(
            flops=flops,
            transcendentals=transcendentals,
            bytes_accessed=bytes_accessed),
    )(h_p, p["w1"], p["b1"], p["w2"], p["b2"])

    # Heads sliced in the wrapper (cheap XLA slices of a lane-dense slab).
    z_pres_p = out[:B, 0:1]
    z_where_loc = out[:B, 1:4]
    z_where_scale = out[:B, 4:7]
    return z_pres_p, z_where_loc, z_where_scale


# ---------------------------------------------------------------------------
# Init (PyTorch-style uniform +-1/sqrt(fan_in))
# ---------------------------------------------------------------------------
def init_params(key, lstm_hidden_dim, hidden=200, out_dim=7):
    k1, k2, k3, k4 = jax.random.split(key, 4)
    lim1 = 1.0 / jnp.sqrt(lstm_hidden_dim)
    lim2 = 1.0 / jnp.sqrt(hidden)
    w1 = jax.random.uniform(k1, (lstm_hidden_dim, hidden), jnp.float32, -lim1, lim1)
    b1 = jax.random.uniform(k2, (1, hidden), jnp.float32, -lim1, lim1)
    w2 = jax.random.uniform(k3, (hidden, out_dim), jnp.float32, -lim2, lim2)
    b2 = jax.random.uniform(k4, (1, out_dim), jnp.float32, -lim2, lim2)
    return w1, b1, w2, b2


if __name__ == "__main__":
    key = jax.random.PRNGKey(0)
    k_h, k_p = jax.random.split(key)

    B = 8                 # batch (amortize launch by batching objects/timesteps)
    lstm_hidden_dim = 32  # LSTM hidden size feeding the predictor

    h = jax.random.normal(k_h, (B, lstm_hidden_dim), dtype=jnp.float32)
    w1, b1, w2, b2 = init_params(k_p, lstm_hidden_dim)

    # Pad/cast the weights ONCE (bf16 MXU operands on all generations).
    params = pad_predictor_params(w1, b1, w2, b2, use_bf16=True)

    z_pres_p, z_where_loc, z_where_scale = predictor_forward(h, params)
    jax.block_until_ready((z_pres_p, z_where_loc, z_where_scale))

    # Pure-JAX f32 reference check.
    z_ref = jnp.maximum(h @ w1 + b1, 0.0) @ w2 + b2
    ref_pres = jax.nn.sigmoid(z_ref[:, 0:1])
    ref_loc = z_ref[:, 1:4]
    ref_scale = jax.nn.softplus(z_ref[:, 4:7])

    atol = 5e-2  # bf16 matmul operands (f32 accumulation) + approx reciprocal
    assert z_pres_p.shape == (B, 1)
    assert z_where_loc.shape == (B, 3)
    assert z_where_scale.shape == (B, 3)
    assert jnp.allclose(z_pres_p, ref_pres, atol=atol)
    assert jnp.allclose(z_where_loc, ref_loc, atol=atol)
    assert jnp.allclose(z_where_scale, ref_scale, atol=atol)

    print("KERNEL_OK")
</pallas_src>

<mosaic_0001>
module attributes {stable_mosaic.version = 11 : i64} {
  func.func @_predictor_kernel(%arg0: i32, %arg1: memref<8x32xbf16, #tpu.memory_space<vmem>>, %arg2: memref<32x256xbf16, #tpu.memory_space<vmem>>, %arg3: memref<1x256xf32, #tpu.memory_space<vmem>>, %arg4: memref<256x128xbf16, #tpu.memory_space<vmem>>, %arg5: memref<1x128xf32, #tpu.memory_space<vmem>>, %arg6: memref<8x128xf32, #tpu.memory_space<vmem>>) attributes {dimension_semantics = [#tpu.dimension_semantics<parallel>], iteration_bounds = array<i64: 1>, scalar_prefetch = 0 : i64, scratch_operands = 0 : i64, tpu.core_type = #tpu.core_type<tc>, window_params = [{transform_indices = @transform_0, window_bounds = array<i64: 8, 32>}, {pipeline_mode = #tpu.pipeline_mode<synchronous>, transform_indices = @transform_1, window_bounds = array<i64: 32, 256>}, {pipeline_mode = #tpu.pipeline_mode<synchronous>, transform_indices = @transform_2, window_bounds = array<i64: 1, 256>}, {pipeline_mode = #tpu.pipeline_mode<synchronous>, transform_indices = @transform_3, window_bounds = array<i64: 256, 128>}, {pipeline_mode = #tpu.pipeline_mode<synchronous>, transform_indices = @transform_4, window_bounds = array<i64: 1, 128>}, {transform_indices = @transform_5, window_bounds = array<i64: 8, 128>}]} {
    %c0 = arith.constant 0 : index
    %c0_0 = arith.constant 0 : index
    %0 = vector.load %arg1[%c0, %c0_0] : memref<8x32xbf16, #tpu.memory_space<vmem>>, vector<8x32xbf16>
    %c0_1 = arith.constant 0 : index
    %c0_2 = arith.constant 0 : index
    %1 = vector.load %arg2[%c0_1, %c0_2] : memref<32x256xbf16, #tpu.memory_space<vmem>>, vector<32x256xbf16>
    %cst = arith.constant dense<0.000000e+00> : vector<8x256xf32>
    %2 = tpu.matmul %0, %1, %cst {dimension_numbers = #tpu.dot_dimension_numbers<[1], [0], [0], [1], [0, 0, 1, 1], [], []>} : vector<8x32xbf16>, vector<32x256xbf16>, vector<8x256xf32> -> vector<8x256xf32>
    %c0_3 = arith.constant 0 : index
    %c0_4 = arith.constant 0 : index
    %3 = vector.load %arg3[%c0_3, %c0_4] : memref<1x256xf32, #tpu.memory_space<vmem>>, vector<1x256xf32>
    %4 = vector.broadcast %3 : vector<1x256xf32> to vector<8x256xf32>
    %5 = arith.addf %2, %4 : vector<8x256xf32>
    %cst_5 = arith.constant 0.000000e+00 : f32
    %6 = vector.broadcast %cst_5 : f32 to vector<8x256xf32>
    %7 = arith.maximumf %5, %6 : vector<8x256xf32>
    %8 = arith.truncf %7 : vector<8x256xf32> to vector<8x256xbf16>
    %c0_6 = arith.constant 0 : index
    %c0_7 = arith.constant 0 : index
    %9 = vector.load %arg4[%c0_6, %c0_7] : memref<256x128xbf16, #tpu.memory_space<vmem>>, vector<256x128xbf16>
    %cst_8 = arith.constant dense<0.000000e+00> : vector<8x128xf32>
    %10 = tpu.matmul %8, %9, %cst_8 {dimension_numbers = #tpu.dot_dimension_numbers<[1], [0], [0], [1], [0, 0, 1, 1], [], []>} : vector<8x256xbf16>, vector<256x128xbf16>, vector<8x128xf32> -> vector<8x128xf32>
    %c0_9 = arith.constant 0 : index
    %c0_10 = arith.constant 0 : index
    %11 = vector.load %arg5[%c0_9, %c0_10] : memref<1x128xf32, #tpu.memory_space<vmem>>, vector<1x128xf32>
    %12 = vector.broadcast %11 : vector<1x128xf32> to vector<8x128xf32>
    %13 = arith.addf %10, %12 : vector<8x128xf32>
    %14 = math.absf %13 : vector<8x128xf32>
    %cst_11 = arith.constant 0.000000e+00 : f32
    %15 = vector.broadcast %cst_11 : f32 to vector<8x128xf32>
    %16 = arith.subf %15, %14 : vector<8x128xf32>
    %17 = math.exp %16 : vector<8x128xf32>
    %cst_12 = arith.constant 1.000000e+00 : f32
    %18 = vector.broadcast %cst_12 : f32 to vector<8x128xf32>
    %19 = arith.addf %18, %17 : vector<8x128xf32>
    %20 = tpu.reciprocal %19 {approx = true} : vector<8x128xf32> -> vector<8x128xf32>
    %cst_13 = arith.constant 0.000000e+00 : f32
    %21 = vector.broadcast %cst_13 : f32 to vector<8x128xf32>
    %22 = arith.cmpf oge, %13, %21 : vector<8x128xf32>
    %23 = arith.mulf %17, %20 : vector<8x128xf32>
    %24 = arith.select %22, %20, %23 : vector<8x128xi1>, vector<8x128xf32>
    %cst_14 = arith.constant 0.000000e+00 : f32
    %25 = vector.broadcast %cst_14 : f32 to vector<8x128xf32>
    %26 = arith.maximumf %13, %25 : vector<8x128xf32>
    %27 = math.log1p %17 : vector<8x128xf32>
    %28 = arith.addf %26, %27 : vector<8x128xf32>
    %29 = tpu.iota {dimensions = array<i32: 1>} : vector<8x128xi32>
    %c1_i32 = arith.constant 1 : i32
    %30 = vector.broadcast %c1_i32 : i32 to vector<8x128xi32>
    %31 = arith.cmpi slt, %29, %30 : vector<8x128xi32>
    %c4_i32 = arith.constant 4 : i32
    %32 = vector.broadcast %c4_i32 : i32 to vector<8x128xi32>
    %33 = arith.cmpi slt, %29, %32 : vector<8x128xi32>
    %c7_i32 = arith.constant 7 : i32
    %34 = vector.broadcast %c7_i32 : i32 to vector<8x128xi32>
    %35 = arith.cmpi slt, %29, %34 : vector<8x128xi32>
    %cst_15 = arith.constant 0.000000e+00 : f32
    %36 = vector.broadcast %cst_15 : f32 to vector<8x128xf32>
    %37 = arith.select %35, %28, %36 : vector<8x128xi1>, vector<8x128xf32>
    %38 = arith.select %33, %13, %37 : vector<8x128xi1>, vector<8x128xf32>
    %39 = arith.select %31, %24, %38 : vector<8x128xi1>, vector<8x128xf32>
    %c0_16 = arith.constant 0 : index
    %c0_17 = arith.constant 0 : index
    %40 = vector.load %arg6[%c0_16, %c0_17] : memref<8x128xf32, #tpu.memory_space<vmem>>, vector<8x128xf32>
    tpu.vector_store %arg6[%c0_16, %c0_17], %39 {strides = array<i32>} : memref<8x128xf32, #tpu.memory_space<vmem>>, vector<8x128xf32>,
    return
  }
  func.func @transform_0(%arg0: i32) -> (i32, i32) {
    %c0_i32 = arith.constant 0 : i32
    %c0_i32_0 = arith.constant 0 : i32
    return %arg0, %c0_i32 : i32, i32
  }
  func.func @transform_1(%arg0: i32) -> (i32, i32) {
    %c0_i32 = arith.constant 0 : i32
    %c0_i32_0 = arith.constant 0 : i32
    %c0_i32_1 = arith.constant 0 : i32
    return %c0_i32, %c0_i32_0 : i32, i32
  }
  func.func @transform_2(%arg0: i32) -> (i32, i32) {
    %c0_i32 = arith.constant 0 : i32
    %c0_i32_0 = arith.constant 0 : i32
    %c0_i32_1 = arith.constant 0 : i32
    return %c0_i32, %c0_i32_0 : i32, i32
  }
  func.func @transform_3(%arg0: i32) -> (i32, i32) {
    %c0_i32 = arith.constant 0 : i32
    %c0_i32_0 = arith.constant 0 : i32
    %c0_i32_1 = arith.constant 0 : i32
    return %c0_i32, %c0_i32_0 : i32, i32
  }
  func.func @transform_4(%arg0: i32) -> (i32, i32) {
    %c0_i32 = arith.constant 0 : i32
    %c0_i32_0 = arith.constant 0 : i32
    %c0_i32_1 = arith.constant 0 : i32
    return %c0_i32, %c0_i32_0 : i32, i32
  }
  func.func @transform_5(%arg0: i32) -> (i32, i32) {
    %c0_i32 = arith.constant 0 : i32
    %c0_i32_0 = arith.constant 0 : i32
    return %arg0, %c0_i32 : i32, i32
  }
}

</mosaic_0001>

<bundles_post_ra>
// kernel: tpu_custom_call.1
= control target key start
LH: loop header
LB: loop body
LE: loop exit
PB: predicated region body
PF: predicated region fallthrough
CT: control target
= control target key end

     0   :  { %10 = vsyncpa [#allocation3], 0  ;;  %s655_s0 = inlined_call_operand.hbm [shape: bf16[8,32], index: 0, kind: input, shape index: {}]   ;;  %s656_s1 = inlined_call_operand.hbm [shape: bf16[32,256], index: 1, kind: input, shape index: {}]   ;;  %s657_s2 = inlined_call_operand.hbm [shape: f32[1,256], index: 2, kind: input, shape index: {}]   ;;  %s658_s3 = inlined_call_operand.hbm [shape: bf16[256,128], index: 3, kind: input, shape index: {}]   ;;  %s659_s4 = inlined_call_operand.vmem [shape: f32[1,128], index: 4, kind: input, shape index: {}]   ;;  %s660_s5 = inlined_call_operand.hbm [shape: f32[8,128], index: 5, kind: output, shape index: {}]  }
   0x1   :  { %11 = vsyncpa [#allocation6], 0 }
   0x2   :  { %12 = vsyncpa [#allocation9], 0  ;;  %s29_s20 = sshll.u32 %s656_s1, 4  ;;  %s30_s20 = int_to_ptr.hbm [resolvable:$true] %s29_s20 }
   0x3   :  { %13 = vsyncpa [#allocation4], 0  ;;  %s598_s21 = smov [#allocation5]   ;;  %s19_s25 = sshll.u32 %s655_s0, 4  ;;  %s20_s25 = int_to_ptr.hbm [resolvable:$true] %s19_s25 }
   0x4   :  { %s31_s22 = sshll.u32 %s598_s21, 4  ;;  %s599_s26 = smov 128   ;;  %s32_s22 = int_to_ptr.vmem [resolvable:$true] %s31_s22 }
   0x5   :  { %s600_s27 = smov 8   ;;  %s601_s28 = smov [#allocation2]  }
   0x6   :  { %37 = dma.hbm_to_vmem [thread:$0]  %s30_s20, 512, %s32_s22, [#allocation6], %s599_s26, %s599_s26, %s600_s27  }
   0x7   :  { %s21_s29 = sshll.u32 %s601_s28, 4  ;;  %s43_s7 = sshll.u32 %s657_s2, 4  ;;  %s22_s29 = int_to_ptr.vmem [resolvable:$true] %s21_s29  ;;  %s44_s7 = int_to_ptr.hbm [resolvable:$true] %s43_s7 }
   0x8   :  { %24 = dma.hbm_to_vmem [thread:$0]  %s20_s25, 64, %s22_s29, [#allocation3]  }
   0x9   :  { %s53_s9 = sshll.u32 %s658_s3, 4  ;;  %s602_s10 = smov [#allocation7]   ;;  %s54_s9 = int_to_ptr.hbm [resolvable:$true] %s53_s9 }
   0xa   :  { %s45_s11 = sshll.u32 %s602_s10, 4  ;;  %s603_s0 = smov [#allocation8]   ;;  %s46_s11 = int_to_ptr.vmem [resolvable:$true] %s45_s11 }
   0xb   :  { %48 = dma.hbm_to_vmem [thread:$0]  %s44_s7, 32, %s46_s11, [#allocation6]  }
   0xc   :  { %s55_s12 = sshll.u32 %s603_s0, 4  ;;  %s604_s13 = smov 64   ;;  %s56_s12 = int_to_ptr.vmem [resolvable:$true] %s55_s12 }
   0xd   :  { %s605_s14 = smov 4  }
   0xe   :  { %61 = dma.hbm_to_vmem [thread:$0]  %s54_s9, 2048, %s56_s12, [#allocation9], %s604_s13, %s604_s13, %s605_s14  }
   0xf   :  { %590 = dma.done.wait [#allocation3], 64  }
  0x10   :  { %591 = vsyncadd [#allocation3], 4294967232 }
  0x11   :  { %592 = dma.done.wait [#allocation6], 544  }
  0x12   :  { %593 = vsyncadd [#allocation6], 4294966752 }
  0x13   :  { %594 = dma.done.wait [#allocation9], 2048  }
  0x14   :  { %595 = vsyncadd [#allocation9], 4294965248  ;;  %v362_v0 = vld [vmem:[#allocation5 + $0x10] sm:$0xf]  ;;  %v437_v1 = vld [vmem:[#allocation5 + $0x14] sm:$0xf0]  ;;  %v324_v55 = vlaneseq }
  0x15   :  { %v436_v2 = vld [vmem:[#allocation5 + $0x14] sm:$0xf]  ;;  %v363_v3 = vor.u32 %v437_v1, %v362_v0  ;;  %v364_v4 = vld [vmem:[#allocation5 + $0x18] sm:$0xf0]  ;;  %v354_v5 = vld [vmem:[#allocation5] sm:$0xf] }
  0x16   :  { %v435_v6 = vld [vmem:[#allocation5 + $0x4] sm:$0xf0]  ;;  %v367_v7 = vor.u32 %v436_v2, %v364_v4  ;;  %v434_v8 = vld [vmem:[#allocation5 + $0x4] sm:$0xf]  ;;  %v356_v9 = vld [vmem:[#allocation5 + $0x8] sm:$0xf0] }
  0x17   :  { %122 = vmatpush.bf16.msra.mxu0 %v363_v3  ;;  %v355_v10 = vor.u32 %v435_v6, %v354_v5  ;;  %v445_v11 = vld [vmem:[#allocation8 + $0x38] sm:$0xff]  ;;  %v359_v13 = vor.u32 %v434_v8, %v356_v9  ;;  %v444_v14 = vld [vmem:[#allocation8 + $0x30] sm:$0xff]  ;;  %vm112_vm0 = vcmask 261120   ;;  %v443_v17 = vld [vmem:[#allocation8 + $0x28] sm:$0xff]  ;;  %v325_v58 = vand.u32 127, %v324_v55  ;;  %s340_s18 = sshll.u32 %s660_s5, 4  ;;  %s341_s18 = int_to_ptr.hbm [resolvable:$true] %s340_s18 }
  0x18   :  { %v453_v12 = vld [vmem:[#allocation8 + $0x78] sm:$0xff]  ;;  %135 = vmatpush.bf16.msra.mxu1 %v367_v7  ;;  %278 = vmatpush.bf16.msra.mxu2 %v445_v11  ;;  %v452_v15 = vld [vmem:[#allocation8 + $0x70] sm:$0xff]  ;;  %v451_v18 = vld [vmem:[#allocation8 + $0x68] sm:$0xff] }
  0x19   :  { %291 = vmatpush.bf16.msra.mxu3 %v453_v12  ;;  %v81_v16 = vld [vmem:[#allocation2] sm:$0xf]  ;;  %v442_v19 = vld [vmem:[#allocation8 + $0x20] sm:$0xff]  ;;  %v440_v23 = vld [vmem:[#allocation8 + $0x10] sm:$0xff]  ;;  %vm328_vm2 = vcmp.lt.s32.totalorder %v325_v58, 7  ;;  %vm327_vm3 = vcmp.lt.s32.totalorder %v325_v58, 4 }
  0x1a   :  { %v450_v20 = vld [vmem:[#allocation8 + $0x60] sm:$0xff]  ;;  %v441_v21 = vld [vmem:[#allocation8 + $0x18] sm:$0xff]  ;;  %v448_v24 = vld [vmem:[#allocation8 + $0x50] sm:$0xff]  ;;  %vm326_vm4 = vcmp.lt.s32.totalorder %v325_v58, 1 }
  0x1b   :  { %123 = vmatpush.bf16.msra.mxu0 %v355_v10  ;;  %v449_v22 = vld [vmem:[#allocation8 + $0x58] sm:$0xff]  ;;  %v439_v25 = vld [vmem:[#allocation8 + $0x8] sm:$0xff]  ;;  %v438_v27 = vld [vmem:[#allocation8] sm:$0xff] }
  0x1c   :  { %136 = vmatpush.bf16.msra.mxu1 %v359_v13  ;;  %279 = vmatpush.bf16.msra.mxu2 %v444_v14  ;;  %v447_v26 = vld [vmem:[#allocation8 + $0x48] sm:$0xff]  ;;  %v446_v28 = vld [vmem:[#allocation8 + $0x40] sm:$0xff]  ;;  %v86_v29 = vld [vmem:[#allocation7] sm:$0x3] }
  0x1d   :  { %292 = vmatpush.bf16.msra.mxu3 %v452_v15  ;;  %v88_v30 = vperm.slane %v86_v29, 0  ;;  %v89_v31 = vperm.slane %v86_v29, 1  ;;  %v463_v42 = vld [vmem:[%s659_s4] ss:$0 sm:$0xff]  ;;  %s606_s4 = smov [#allocation10]  }
  0x1e   :  { %368 = vmatmul.msk.bf16.vlgmr.msra.gmra.mxu0 %vm112_vm0, %v81_v16  ;;  %s338_s15 = sshll.u32 %s606_s4, 4  ;;  %s339_s15 = int_to_ptr.vmem [resolvable:$true] %s338_s15 }
  0x1f   :  { %369 = vmatmul.msk.bf16.vlgmr.msra.gmra.mxu1 %vm112_vm0, %v81_v16 }
  0x20   :  { %280 = vmatpush.bf16.msra.mxu2 %v443_v17 }
  0x21   :  { %293 = vmatpush.bf16.msra.mxu3 %v451_v18 }
  0x24   :  { %281 = vmatpush.bf16.msra.mxu2 %v442_v19 }
  0x25   :  { %294 = vmatpush.bf16.msra.mxu3 %v450_v20 }
  0x28   :  { %282 = vmatpush.bf16.msra.mxu2 %v441_v21 }
  0x29   :  { %295 = vmatpush.bf16.msra.mxu3 %v449_v22 }
  0x2c   :  { %283 = vmatpush.bf16.msra.mxu2 %v440_v23 }
  0x2d   :  { %296 = vmatpush.bf16.msra.mxu3 %v448_v24 }
  0x30   :  { %284 = vmatpush.bf16.msra.mxu2 %v439_v25 }
  0x31   :  { %297 = vmatpush.bf16.msra.mxu3 %v447_v26 }
  0x34   :  { %285 = vmatpush.bf16.msra.mxu2 %v438_v27 }
  0x35   :  { %298 = vmatpush.bf16.msra.mxu3 %v446_v28 }
  0x9b   :  { %v125_v32 = vpop.f32.mrf.mxu0 }
  0x9c   :  { %v126_v33 = vadd.f32 %v125_v32, %v88_v30  ;;  %v138_v34 = vpop.f32.mrf.mxu1 }
  0x9d   :  { %v139_v35 = vadd.f32 %v138_v34, %v89_v31 }
  0x9e   :  { %v142_v36 = vmax.f32 %v126_v33, 0.0 }
  0x9f   :  { %v143_v37 = vmax.f32 %v139_v35, 0.0 }
  0xa0   :  { %v144_v38 = vpack.c.bf16 %v142_v36, %v142_v36 }
  0xa1   :  { %v145_v39 = vpack.c.bf16 %v143_v37, %v143_v37 }
  0xa2   :  { %286 = vmatmul.bf16.vlgmr.msra.gmra.mxu2 %v144_v38 }
  0xa3   :  { %299 = vmatmul.bf16.vlgmr.msra.gmra.mxu3 %v145_v39  ;;  %v127_v40 = vpop.f32.mrf.mxu0 }
  0xa4   :  { %v140_v41 = vpop.f32.mrf.mxu1 }
 0x125   :  { %v287_v43 = vpop.f32.mrf.mxu2 }
 0x126   :  { %v288_v44 = vadd.f32 %v463_v42, %v287_v43  ;;  %v300_v45 = vpop.f32.mrf.mxu3 }
 0x128   :  { %v301_v46 = vadd.f32 %v300_v45, %v288_v44 }
 0x12a   :  { %v304_v47 = vand.u32 2147483647, %v301_v46  ;;  %v313_v63 = vmax.f32 %v301_v46, 0.0  ;;  %vm310_vm5 = vcmp.ge.f32.partialorder %v301_v46, 0.0 }
 0x12c   :  { %v305_v48 = vsub.f32 0.0, %v304_v47 }
 0x12d   :  { %v289_v49 = vpop.f32.mrf.mxu2 }
 0x12e   :  { %v306_v50 = vmul.f32 1.442695, %v305_v48  ;;  %v302_v51 = vpop.f32.mrf.mxu3 }
 0x130   :  { %464 = vpow2.f32 %v306_v50 }
 0x136   :  { %v465_v52 = vpop.eup %464 }
 0x137   :  { %v308_v53 = vadd.f32 1.0, %v465_v52  ;;  %v317_v54 = vmul.f32 -0.5, %v465_v52  ;;  %v320_v57 = vand.u32 2147483647, %v465_v52 }
 0x139   :  { %466 = vlog2.f32 %v308_v53  ;;  %v318_v56 = vadd.f32 1.0, %v317_v54  ;;  %vm321_vm1 = vcmp.lt.f32.partialorder %v320_v57, 0.0004427343 }
 0x13a   :  { %468 = vrcp.f32 %v308_v53 }
 0x13b   :  { %v319_v62 = vmul.f32 %v465_v52, %v318_v56 }
 0x13f   :  { %v467_v59 = vpop.eup %466 }
 0x140   :  { %v469_v60 = vpop.eup %468  ;;  %v316_v61 = vmul.f32 0.6931472, %v467_v59 }
 0x141   :  { %v311_v1 = vmul.f32 %v469_v60, %v465_v52 }
 0x142   :  { %v322_v0 = vsel %vm321_vm1, %v319_v62, %v316_v61 }
 0x143   :  { %v323_v2 = vadd.f32 %v322_v0, %v313_v63  ;;  %v312_v4 = vsel %vm310_vm5, %v469_v60, %v311_v1 }
 0x145   :  { %v329_v3 = vsel %vm328_vm2, %v323_v2, 0.0 }
 0x146   :  { %v330_v5 = vsel %vm327_vm3, %v301_v46, %v329_v3 }
 0x147   :  { %v331_v6 = vsel %vm326_vm4, %v312_v4, %v330_v5 }
 0x148   :  { %332 = vst [vmem:[#allocation10] sm:$0xff] %v331_v6 }
 0x149   :  { %343 = dma.vmem_to_hbm [thread:$0]  %s339_s15, 128, %s341_s18, [#allocation4]  }
 0x14a   :  { %596 = dma.done.wait [#allocation4], 128  }
 0x14b   :  { %597 = vsyncadd [#allocation4], 4294967168 }
 0x14c   :  { %348 = vsyncpa [#allocation3], 1 }
 0x14d   :  { %349 = vsyncpa [#allocation6], 1 }
 0x14e   :  { %350 = vsyncpa [#allocation9], 1 }
 0x14f   :  { %351 = vsyncpa [#allocation4], 1 }

</bundles_post_ra>
